<compile_context>
chip_gen: v5e
topology: v5e:2x2
jax: 0.10.0
libtpu: 0.0.40
codegen_flags: <defaults>
</compile_context>

<pallas_src>
import functools

import numpy as np
import jax
import jax.numpy as jnp
from jax.experimental import pallas as pl
from jax.experimental.pallas import tpu as pltpu


_LANE = 128
_MASK_DTYPE = jnp.bfloat16   # 0/1 is exact in bf16; halves mask HBM/VMEM vs f32
_MASK_BYTES = 2


@functools.lru_cache(maxsize=None)
def _vmem_capacity_bytes() -> int:
    try:
        cap = int(getattr(pltpu.get_tpu_info(), "vmem_capacity_bytes", 0))
        if cap > 0:
            return cap
    except Exception:
        pass
    return 64 * 1024 * 1024  # conservative default (v7x per-TC VMEM)


def _budgets():
    """Per-generation working-set budget, vmem_limit cap and mask residency limit."""
    cap = _vmem_capacity_bytes()
    if cap >= 100 * 1024 * 1024:
        # v5e / v6e: 128 MiB VMEM -> use roughly half as working set.
        return dict(budget=56 << 20, limit_cap=96 << 20,
                    resident_limit=40 << 20, x_bufs=3)
    # v7x: 64 MiB per TensorCore -> leave headroom for Mosaic internal scratch.
    return dict(budget=28 << 20, limit_cap=48 << 20,
                resident_limit=20 << 20, x_bufs=2)


def _sublane_multiple(itemsize: int) -> int:
    # f32 -> 8 rows per vreg, bf16 -> 16.
    return max(8, 8 * (4 // max(1, itemsize)))


def _round_up(x: int, m: int) -> int:
    return ((x + m - 1) // m) * m


@functools.lru_cache(maxsize=None)
def _pool_constants(in_len: int, out_len: int, out_used: int, pad_len: int):
    """0/1 membership mask (pad_len, out_used) in bf16 + f32 reciprocal (1, out_used).

    Windows follow PyTorch adaptive_avg_pool1d:
      start_i = floor(i * L / out), end_i = ceil((i + 1) * L / out).
    Padded rows (L tail) and padded columns (lane padding) are zero; padded
    reciprocal entries are 1.0 (they multiply an exact zero).
    """
    mask = np.zeros((pad_len, out_used), dtype=np.float32)
    recip = np.ones((1, out_used), dtype=np.float32)
    for i in range(out_len):
        start = (i * in_len) // out_len
        end = -((-(i + 1) * in_len) // out_len)  # ceil division
        mask[start:end, i] = 1.0
        recip[0, i] = 1.0 / float(end - start)
    return (jnp.asarray(mask, dtype=_MASK_DTYPE),
            jnp.asarray(recip, dtype=jnp.float32))


def _pool_kernel(x_ref, p_ref, r_ref, o_ref):
    # (TM, L) @ (L, out) on the MXU, f32 accumulation, per-column 1/window scale.
    x = x_ref[...]
    p = p_ref[...]
    if p.dtype != x.dtype:
        p = p.astype(x.dtype)          # cheap VPU upconvert of the bf16 0/1 mask
    acc = jnp.dot(x, p, preferred_element_type=jnp.float32)
    o_ref[...] = (acc * r_ref[...]).astype(o_ref.dtype)


def _pool_kernel_ktiled(x_ref, p_ref, r_ref, o_ref, acc_ref):
    # Reduction axis tiled: accumulate partial (TM, out) products in f32 scratch.
    @pl.when(pl.program_id(1) == 0)
    def _():
        acc_ref[...] = jnp.zeros_like(acc_ref)

    x = x_ref[...]
    p = p_ref[...]
    if p.dtype != x.dtype:
        p = p.astype(x.dtype)
    acc_ref[...] += jnp.dot(x, p, preferred_element_type=jnp.float32)

    @pl.when(pl.program_id(1) == pl.num_programs(1) - 1)
    def _():
        o_ref[...] = (acc_ref[...] * r_ref[...]).astype(o_ref.dtype)


def _choose_tm(m: int, sub: int, avail: int, per_row: int, cap: int = 2048) -> int:
    tm = max(1, avail // max(1, per_row))
    tm = max(sub, (tm // sub) * sub)
    tm = min(tm, cap)
    if m >= 4 * sub:
        # Keep >= 4 row steps: v7x megacore sharding needs >= 2 per TensorCore and
        # v5e/v6e regain DMA/compute overlap instead of one monolithic block.
        tm = min(tm, max(sub, (m // (4 * sub)) * sub))
    if tm >= m:
        tm = m
    return tm


def _spec(block_shape, index_map, mode, use_modes):
    if use_modes and mode is not None:
        return pl.BlockSpec(block_shape, index_map, pipeline_mode=mode)
    return pl.BlockSpec(block_shape, index_map)


def _with_mode_fallback(builder):
    # Defensive: if pipeline_mode=pl.Buffered(k) is rejected by this jax build,
    # retry with default (double-buffered) specs; only the VMEM footprint changes.
    try:
        return builder(True)
    except Exception:
        return builder(False)


def adaptive_avg_pool1d(x: jax.Array, output_size: int) -> jax.Array:
    """Equivalent of torch.nn.functional.adaptive_avg_pool1d(x, output_size)."""
    n, c, l = x.shape
    out_len = int(output_size)
    m = n * c

    orig_dtype = x.dtype
    if x.dtype not in (jnp.float32, jnp.bfloat16):
        # Integer / f16 / f64 inputs: compute in f32 (no integer MXU on v7x).
        x = x.astype(jnp.float32)
    x2 = x.reshape(m, l)

    x_bytes = int(np.dtype(x.dtype).itemsize)
    out_bytes = x_bytes
    sub = _sublane_multiple(x_bytes)

    cfg = _budgets()
    budget = cfg["budget"]
    limit_cap = cfg["limit_cap"]
    resident_limit = cfg["resident_limit"]
    x_bufs_pref = cfg["x_bufs"]

    # --- Plan: prefer the mask-resident path, with lane-dense (128-multiple) output
    # padding if the padded mask still fits residency. ---
    out_pad = _round_up(out_len, _LANE)
    out_candidates = (out_pad, out_len) if out_pad != out_len else (out_len,)
    resident_plan = None
    for out_used in out_candidates:
        mask_bytes = l * out_used * _MASK_BYTES
        if mask_bytes > resident_limit:
            continue
        for x_bufs in sorted({x_bufs_pref, 2}, reverse=True):
            resident = mask_bytes + out_used * 4          # Buffered(1) mask + recip
            per_row = x_bufs * l * x_bytes + 2 * out_used * out_bytes
            if resident + per_row * sub <= budget:
                resident_plan = (out_used, x_bufs, resident, per_row)
                break
        if resident_plan is not None:
            break

    if resident_plan is not None:
        out_used, x_bufs, resident, per_row = resident_plan
        mask, recip = _pool_constants(l, out_len, out_used, l)
        tm = _choose_tm(m, sub, budget - resident, per_row)
        n_row_steps = int(pl.cdiv(m, tm))
        x_mode = pl.Buffered(x_bufs) if (x_bufs > 2 and n_row_steps >= x_bufs) else None
        vmem_need = resident + per_row * tm
        vmem_limit = int(min(max(vmem_need + (8 << 20), 32 << 20), limit_cap))

        def build(use_modes):
            return pl.pallas_call(
                _pool_kernel,
                out_shape=jax.ShapeDtypeStruct((m, out_used), x2.dtype),
                grid=(n_row_steps,),
                in_specs=[
                    _spec((tm, l), lambda i: (i, 0), x_mode, use_modes),
                    _spec((l, out_used), lambda i: (0, 0), pl.Buffered(1), use_modes),
                    _spec((1, out_used), lambda i: (0, 0), pl.Buffered(1), use_modes),
                ],
                out_specs=pl.BlockSpec((tm, out_used), lambda i: (i, 0)),
                compiler_params=pltpu.CompilerParams(
                    dimension_semantics=("parallel",),
                    vmem_limit_bytes=vmem_limit,
                ),
                cost_estimate=pl.CostEstimate(
                    flops=int(2 * m * l * out_used),
                    transcendentals=0,
                    bytes_accessed=int(m * l * x_bytes
                                       + l * out_used * _MASK_BYTES
                                       + m * out_used * out_bytes),
                ),
            )(x2, mask, recip)

        out2 = _with_mode_fallback(build)
    else:
        # --- Mask too large for residency or single-row working set too big:
        # tile the reduction (L) axis; the mask is re-streamed once per row tile. ---
        # TODO(synk): banded/column-tiled formulation for very large out_len on v5e
        # (dense zero-heavy matmul becomes MXU-bound there).
        tk = 2048
        while tk > 256 and (2 * tk * out_len * _MASK_BYTES > budget // 4
                            or 2 * tk * x_bytes * sub > budget // 2):
            tk //= 2
        l_pad = _round_up(l, tk)
        mask, recip = _pool_constants(l, out_len, out_len, l_pad)
        if l_pad != l:
            # Zero-pad L so every K block is exact (zero rows contribute nothing).
            x2 = jnp.pad(x2, ((0, 0), (0, l_pad - l)))

        resident = out_len * 4 + 2 * tk * out_len * _MASK_BYTES  # recip + dbl-buf mask tile
        per_row = 2 * tk * x_bytes + 2 * out_len * out_bytes + out_len * 4  # x/out blocks + f32 acc
        tm = _choose_tm(m, sub, budget - resident, per_row, cap=1024)
        n_row_steps = int(pl.cdiv(m, tm))
        vmem_need = resident + per_row * tm
        vmem_limit = int(min(max(vmem_need + (8 << 20), 32 << 20), limit_cap))

        def build(use_modes):
            return pl.pallas_call(
                _pool_kernel_ktiled,
                out_shape=jax.ShapeDtypeStruct((m, out_len), x2.dtype),
                grid=(n_row_steps, l_pad // tk),
                in_specs=[
                    pl.BlockSpec((tm, tk), lambda i, k: (i, k)),
                    pl.BlockSpec((tk, out_len), lambda i, k: (k, 0)),
                    _spec((1, out_len), lambda i, k: (0, 0), pl.Buffered(1), use_modes),
                ],
                out_specs=pl.BlockSpec((tm, out_len), lambda i, k: (i, 0)),
                scratch_shapes=[pltpu.VMEM((tm, out_len), jnp.float32)],
                compiler_params=pltpu.CompilerParams(
                    dimension_semantics=("parallel", "arbitrary"),
                    vmem_limit_bytes=vmem_limit,
                ),
                cost_estimate=pl.CostEstimate(
                    flops=int(2 * m * l_pad * out_len),
                    transcendentals=0,
                    bytes_accessed=int(
                        m * l_pad * x_bytes
                        + n_row_steps * l_pad * out_len * _MASK_BYTES  # mask refetch
                        + m * out_len * out_bytes),
                ),
            )(x2, mask, recip)

        out2 = _with_mode_fallback(build)
        out_used = out_len

    if out_used != out_len:
        out2 = out2[:, :out_len]
    out = out2.reshape(n, c, out_len)
    if out.dtype != orig_dtype:
        out = out.astype(orig_dtype)
    return out


class Downsample:
    """Mirror of the PyTorch module: forward = adaptive_avg_pool1d(x, output_size)."""

    def __init__(self, output_size: int):
        self.output_size = int(output_size)

    def __call__(self, x: jax.Array) -> jax.Array:
        return adaptive_avg_pool1d(x, self.output_size)


def _reference_adaptive_avg_pool1d(x: np.ndarray, output_size: int) -> np.ndarray:
    n, c, l = x.shape
    out = np.zeros((n, c, output_size), dtype=np.float32)
    for i in range(output_size):
        start = (i * l) // output_size
        end = -((-(i + 1) * l) // output_size)
        out[..., i] = x[..., start:end].astype(np.float32).mean(axis=-1)
    return out


if __name__ == "__main__":
    key = jax.random.PRNGKey(0)
    # Small NCL input: batch=2, channels=4, length=16.
    x = jax.random.normal(key, (2, 4, 16), dtype=jnp.float32)

    # Case 1: even windows (16 -> 8).
    model = Downsample(8)
    y = jax.block_until_ready(model(x))
    ref = _reference_adaptive_avg_pool1d(np.asarray(x), 8)
    np.testing.assert_allclose(np.asarray(y), ref, rtol=1e-5, atol=1e-5)

    # Case 2: uneven / overlapping adaptive windows (16 -> 6).
    model6 = Downsample(6)
    y6 = jax.block_until_ready(model6(x))
    ref6 = _reference_adaptive_avg_pool1d(np.asarray(x), 6)
    np.testing.assert_allclose(np.asarray(y6), ref6, rtol=1e-5, atol=1e-5)

    print("KERNEL_OK")
</pallas_src>

<mosaic_0001>
module attributes {stable_mosaic.version = 11 : i64} {
  func.func @_pool_kernel(%arg0: i32, %arg1: memref<8x16xf32, #tpu.memory_space<vmem>>, %arg2: memref<16x128xbf16, #tpu.memory_space<vmem>>, %arg3: memref<1x128xf32, #tpu.memory_space<vmem>>, %arg4: memref<8x128xf32, #tpu.memory_space<vmem>>) attributes {dimension_semantics = [#tpu.dimension_semantics<parallel>], iteration_bounds = array<i64: 1>, scalar_prefetch = 0 : i64, scratch_operands = 0 : i64, tpu.core_type = #tpu.core_type<tc>, window_params = [{transform_indices = @transform_0, window_bounds = array<i64: 8, 16>}, {pipeline_mode = #tpu.pipeline_mode<synchronous>, transform_indices = @transform_1, window_bounds = array<i64: 16, 128>}, {pipeline_mode = #tpu.pipeline_mode<synchronous>, transform_indices = @transform_2, window_bounds = array<i64: 1, 128>}, {transform_indices = @transform_3, window_bounds = array<i64: 8, 128>}]} {
    %c0 = arith.constant 0 : index
    %c0_0 = arith.constant 0 : index
    %0 = vector.load %arg1[%c0, %c0_0] : memref<8x16xf32, #tpu.memory_space<vmem>>, vector<8x16xf32>
    %c0_1 = arith.constant 0 : index
    %c0_2 = arith.constant 0 : index
    %1 = vector.load %arg2[%c0_1, %c0_2] : memref<16x128xbf16, #tpu.memory_space<vmem>>, vector<16x128xbf16>
    %2 = arith.extf %1 : vector<16x128xbf16> to vector<16x128xf32>
    %cst = arith.constant dense<0.000000e+00> : vector<8x128xf32>
    %3 = tpu.matmul %0, %2, %cst {dimension_numbers = #tpu.dot_dimension_numbers<[1], [0], [0], [1], [0, 0, 1, 1], [], []>} : vector<8x16xf32>, vector<16x128xf32>, vector<8x128xf32> -> vector<8x128xf32>
    %c0_3 = arith.constant 0 : index
    %c0_4 = arith.constant 0 : index
    %4 = vector.load %arg3[%c0_3, %c0_4] : memref<1x128xf32, #tpu.memory_space<vmem>>, vector<1x128xf32>
    %5 = vector.broadcast %4 : vector<1x128xf32> to vector<8x128xf32>
    %6 = arith.mulf %3, %5 : vector<8x128xf32>
    %c0_5 = arith.constant 0 : index
    %c0_6 = arith.constant 0 : index
    %7 = vector.load %arg4[%c0_5, %c0_6] : memref<8x128xf32, #tpu.memory_space<vmem>>, vector<8x128xf32>
    tpu.vector_store %arg4[%c0_5, %c0_6], %6 {strides = array<i32>} : memref<8x128xf32, #tpu.memory_space<vmem>>, vector<8x128xf32>,
    return
  }
  func.func @transform_0(%arg0: i32) -> (i32, i32) {
    %c0_i32 = arith.constant 0 : i32
    %c0_i32_0 = arith.constant 0 : i32
    return %arg0, %c0_i32 : i32, i32
  }
  func.func @transform_1(%arg0: i32) -> (i32, i32) {
    %c0_i32 = arith.constant 0 : i32
    %c0_i32_0 = arith.constant 0 : i32
    %c0_i32_1 = arith.constant 0 : i32
    return %c0_i32, %c0_i32_0 : i32, i32
  }
  func.func @transform_2(%arg0: i32) -> (i32, i32) {
    %c0_i32 = arith.constant 0 : i32
    %c0_i32_0 = arith.constant 0 : i32
    %c0_i32_1 = arith.constant 0 : i32
    return %c0_i32, %c0_i32_0 : i32, i32
  }
  func.func @transform_3(%arg0: i32) -> (i32, i32) {
    %c0_i32 = arith.constant 0 : i32
    %c0_i32_0 = arith.constant 0 : i32
    return %arg0, %c0_i32 : i32, i32
  }
}

module attributes {stable_mosaic.version = 11 : i64} {
  func.func @_pool_kernel(%arg0: i32, %arg1: memref<8x16xf32, #tpu.memory_space<vmem>>, %arg2: memref<16x128xbf16, #tpu.memory_space<vmem>>, %arg3: memref<1x128xf32, #tpu.memory_space<vmem>>, %arg4: memref<8x128xf32, #tpu.memory_space<vmem>>) attributes {dimension_semantics = [#tpu.dimension_semantics<parallel>], iteration_bounds = array<i64: 1>, scalar_prefetch = 0 : i64, scratch_operands = 0 : i64, tpu.core_type = #tpu.core_type<tc>, window_params = [{transform_indices = @transform_0, window_bounds = array<i64: 8, 16>}, {pipeline_mode = #tpu.pipeline_mode<synchronous>, transform_indices = @transform_1, window_bounds = array<i64: 16, 128>}, {pipeline_mode = #tpu.pipeline_mode<synchronous>, transform_indices = @transform_2, window_bounds = array<i64: 1, 128>}, {transform_indices = @transform_3, window_bounds = array<i64: 8, 128>}]} {
    %c0 = arith.constant 0 : index
    %c0_0 = arith.constant 0 : index
    %0 = vector.load %arg1[%c0, %c0_0] : memref<8x16xf32, #tpu.memory_space<vmem>>, vector<8x16xf32>
    %c0_1 = arith.constant 0 : index
    %c0_2 = arith.constant 0 : index
    %1 = vector.load %arg2[%c0_1, %c0_2] : memref<16x128xbf16, #tpu.memory_space<vmem>>, vector<16x128xbf16>
    %2 = arith.extf %1 : vector<16x128xbf16> to vector<16x128xf32>
    %cst = arith.constant dense<0.000000e+00> : vector<8x128xf32>
    %3 = tpu.matmul %0, %2, %cst {dimension_numbers = #tpu.dot_dimension_numbers<[1], [0], [0], [1], [0, 0, 1, 1], [], []>} : vector<8x16xf32>, vector<16x128xf32>, vector<8x128xf32> -> vector<8x128xf32>
    %c0_3 = arith.constant 0 : index
    %c0_4 = arith.constant 0 : index
    %4 = vector.load %arg3[%c0_3, %c0_4] : memref<1x128xf32, #tpu.memory_space<vmem>>, vector<1x128xf32>
    %5 = vector.broadcast %4 : vector<1x128xf32> to vector<8x128xf32>
    %6 = arith.mulf %3, %5 : vector<8x128xf32>
    %c0_5 = arith.constant 0 : index
    %c0_6 = arith.constant 0 : index
    %7 = vector.load %arg4[%c0_5, %c0_6] : memref<8x128xf32, #tpu.memory_space<vmem>>, vector<8x128xf32>
    tpu.vector_store %arg4[%c0_5, %c0_6], %6 {strides = array<i32>} : memref<8x128xf32, #tpu.memory_space<vmem>>, vector<8x128xf32>,
    return
  }
  func.func @transform_0(%arg0: i32) -> (i32, i32) {
    %c0_i32 = arith.constant 0 : i32
    %c0_i32_0 = arith.constant 0 : i32
    return %arg0, %c0_i32 : i32, i32
  }
  func.func @transform_1(%arg0: i32) -> (i32, i32) {
    %c0_i32 = arith.constant 0 : i32
    %c0_i32_0 = arith.constant 0 : i32
    %c0_i32_1 = arith.constant 0 : i32
    return %c0_i32, %c0_i32_0 : i32, i32
  }
  func.func @transform_2(%arg0: i32) -> (i32, i32) {
    %c0_i32 = arith.constant 0 : i32
    %c0_i32_0 = arith.constant 0 : i32
    %c0_i32_1 = arith.constant 0 : i32
    return %c0_i32, %c0_i32_0 : i32, i32
  }
  func.func @transform_3(%arg0: i32) -> (i32, i32) {
    %c0_i32 = arith.constant 0 : i32
    %c0_i32_0 = arith.constant 0 : i32
    return %arg0, %c0_i32 : i32, i32
  }
}

</mosaic_0001>

<bundles_post_ra>
// kernel: tpu_custom_call.1
= control target key start
LH: loop header
LB: loop body
LE: loop exit
PB: predicated region body
PF: predicated region fallthrough
CT: control target
= control target key end

     0   :  { %8 = vsyncpa [#allocation3], 0  ;;  %s224_s0 = inlined_call_operand.hbm [shape: f32[8,16], index: 0, kind: input, shape index: {}]   ;;  %s225_s1 = inlined_call_operand.hbm [shape: bf16[16,128], index: 1, kind: input, shape index: {}]   ;;  %s226_s2 = inlined_call_operand.vmem [shape: f32[1,128], index: 2, kind: input, shape index: {}]   ;;  %s227_s3 = inlined_call_operand.hbm [shape: f32[8,128], index: 3, kind: output, shape index: {}]  }
   0x1   :  { %9 = vsyncpa [#allocation6], 0 }
   0x2   :  { %10 = vsyncpa [#allocation4], 0  ;;  %s16_s14 = sshll.u32 %s224_s0, 4  ;;  %s187_s15 = smov [#allocation2]   ;;  %s17_s14 = int_to_ptr.hbm [resolvable:$true] %s16_s14 }
   0x3   :  { %s18_s16 = sshll.u32 %s187_s15, 4  ;;  %s26_s19 = sshll.u32 %s225_s1, 4  ;;  %s19_s16 = int_to_ptr.vmem [resolvable:$true] %s18_s16  ;;  %s27_s19 = int_to_ptr.hbm [resolvable:$true] %s26_s19 }
   0x4   :  { %21 = dma.hbm_to_vmem [thread:$0]  %s17_s14, 128, %s19_s16, [#allocation3]  }
   0x5   :  { %s188_s20 = smov [#allocation5]   ;;  %s189_s22 = smov 64  }
   0x6   :  { %s28_s21 = sshll.u32 %s188_s20, 4  ;;  %s190_s23 = smov 4   ;;  %s29_s21 = int_to_ptr.vmem [resolvable:$true] %s28_s21 }
   0x7   :  { %34 = dma.hbm_to_vmem [thread:$0]  %s27_s19, 128, %s29_s21, [#allocation6], %s189_s22, %s189_s22, %s190_s23  }
   0x8   :  { %181 = dma.done.wait [#allocation3], 128  }
   0x9   :  { %182 = vsyncadd [#allocation3], 4294967168 }
   0xa   :  { %183 = dma.done.wait [#allocation6], 128  }
   0xb   :  { %184 = vsyncadd [#allocation6], 4294967168  ;;  %v100_v0 = vld [vmem:[#allocation5] sm:$0xff]   ;;  %v45_v3 = vld [vmem:[#allocation2] sm:$0xff]  ;;  %vm50_vm0 = vcmask 130048   ;;  %s191_s24 = smov [#allocation7]  }
   0xc   :  { %v102_v1 = vunpack.c.h.bf16 %v100_v0  ;;  %v101_v2 = vunpack.c.l.bf16 %v100_v0  ;;  %v108_v4 = vld [vmem:[%s226_s2] ss:$0 sm:$0xff]  ;;  %s85_s25 = sshll.u32 %s191_s24, 4  ;;  %s87_s28 = sshll.u32 %s227_s3, 4  ;;  %s86_s25 = int_to_ptr.vmem [resolvable:$true] %s85_s25  ;;  %s88_s28 = int_to_ptr.hbm [resolvable:$true] %s87_s28 }
   0xe   :  { %68 = vmatpush.msra.mxu0 %v102_v1 }
  0x10   :  { %69 = vmatpush.msra.mxu0 %v101_v2 }
  0x11   :  { %98 = vmatmul.msk.f32.vlgmr.msra.gmra.mxu0 %vm50_vm0, %v45_v3 }
  0x8e   :  { %v71_v5 = vpop.f32.mrf.mxu0 }
  0x8f   :  { %v78_v6 = vmul.f32 %v108_v4, %v71_v5 }
  0x91   :  { %79 = vst [vmem:[#allocation7] sm:$0xff] %v78_v6 }
  0x92   :  { %90 = dma.vmem_to_hbm [thread:$0]  %s86_s25, 128, %s88_s28, [#allocation4]  }
  0x93   :  { %185 = dma.done.wait [#allocation4], 128  }
  0x94   :  { %186 = vsyncadd [#allocation4], 4294967168 }
  0x95   :  { %95 = vsyncpa [#allocation3], 1 }
  0x96   :  { %96 = vsyncpa [#allocation6], 1 }
  0x97   :  { %97 = vsyncpa [#allocation4], 1 }

// kernel: tpu_custom_call.1
= control target key start
LH: loop header
LB: loop body
LE: loop exit
PB: predicated region body
PF: predicated region fallthrough
CT: control target
= control target key end

     0   :  { %8 = vsyncpa [#allocation3], 0  ;;  %s224_s0 = inlined_call_operand.hbm [shape: f32[8,16], index: 0, kind: input, shape index: {}]   ;;  %s225_s1 = inlined_call_operand.hbm [shape: bf16[16,128], index: 1, kind: input, shape index: {}]   ;;  %s226_s2 = inlined_call_operand.vmem [shape: f32[1,128], index: 2, kind: input, shape index: {}]   ;;  %s227_s3 = inlined_call_operand.hbm [shape: f32[8,128], index: 3, kind: output, shape index: {}]  }
   0x1   :  { %9 = vsyncpa [#allocation6], 0 }
   0x2   :  { %10 = vsyncpa [#allocation4], 0  ;;  %s16_s14 = sshll.u32 %s224_s0, 4  ;;  %s187_s15 = smov [#allocation2]   ;;  %s17_s14 = int_to_ptr.hbm [resolvable:$true] %s16_s14 }
   0x3   :  { %s18_s16 = sshll.u32 %s187_s15, 4  ;;  %s26_s19 = sshll.u32 %s225_s1, 4  ;;  %s19_s16 = int_to_ptr.vmem [resolvable:$true] %s18_s16  ;;  %s27_s19 = int_to_ptr.hbm [resolvable:$true] %s26_s19 }
   0x4   :  { %21 = dma.hbm_to_vmem [thread:$0]  %s17_s14, 128, %s19_s16, [#allocation3]  }
   0x5   :  { %s188_s20 = smov [#allocation5]   ;;  %s189_s22 = smov 64  }
   0x6   :  { %s28_s21 = sshll.u32 %s188_s20, 4  ;;  %s190_s23 = smov 4   ;;  %s29_s21 = int_to_ptr.vmem [resolvable:$true] %s28_s21 }
   0x7   :  { %34 = dma.hbm_to_vmem [thread:$0]  %s27_s19, 128, %s29_s21, [#allocation6], %s189_s22, %s189_s22, %s190_s23  }
   0x8   :  { %181 = dma.done.wait [#allocation3], 128  }
   0x9   :  { %182 = vsyncadd [#allocation3], 4294967168 }
   0xa   :  { %183 = dma.done.wait [#allocation6], 128  }
   0xb   :  { %184 = vsyncadd [#allocation6], 4294967168  ;;  %v100_v0 = vld [vmem:[#allocation5] sm:$0xff]   ;;  %v45_v3 = vld [vmem:[#allocation2] sm:$0xff]  ;;  %vm50_vm0 = vcmask 130048   ;;  %s191_s24 = smov [#allocation7]  }
   0xc   :  { %v102_v1 = vunpack.c.h.bf16 %v100_v0  ;;  %v101_v2 = vunpack.c.l.bf16 %v100_v0  ;;  %v108_v4 = vld [vmem:[%s226_s2] ss:$0 sm:$0xff]  ;;  %s85_s25 = sshll.u32 %s191_s24, 4  ;;  %s87_s28 = sshll.u32 %s227_s3, 4  ;;  %s86_s25 = int_to_ptr.vmem [resolvable:$true] %s85_s25  ;;  %s88_s28 = int_to_ptr.hbm [resolvable:$true] %s87_s28 }
   0xe   :  { %68 = vmatpush.msra.mxu0 %v102_v1 }
  0x10   :  { %69 = vmatpush.msra.mxu0 %v101_v2 }
  0x11   :  { %98 = vmatmul.msk.f32.vlgmr.msra.gmra.mxu0 %vm50_vm0, %v45_v3 }
  0x8e   :  { %v71_v5 = vpop.f32.mrf.mxu0 }
  0x8f   :  { %v78_v6 = vmul.f32 %v108_v4, %v71_v5 }
  0x91   :  { %79 = vst [vmem:[#allocation7] sm:$0xff] %v78_v6 }
  0x92   :  { %90 = dma.vmem_to_hbm [thread:$0]  %s86_s25, 128, %s88_s28, [#allocation4]  }
  0x93   :  { %185 = dma.done.wait [#allocation4], 128  }
  0x94   :  { %186 = vsyncadd [#allocation4], 4294967168 }
  0x95   :  { %95 = vsyncpa [#allocation3], 1 }
  0x96   :  { %96 = vsyncpa [#allocation6], 1 }
  0x97   :  { %97 = vsyncpa [#allocation4], 1 }

</bundles_post_ra>
